<compile_context>
chip_gen: v6e
topology: v6e:2x2x1
jax: 0.10.0
libtpu: 0.0.40
codegen_flags: <defaults>
</compile_context>

<pallas_src>
import jax
import jax.numpy as jnp
from jax.experimental import pallas as pl
from jax.experimental.pallas import tpu as pltpu


def _linreg_kernel(ab_ref, x_ref, o_ref):
    # ab_ref: (2,) f32 in SMEM -> [a, b]; x_ref / o_ref: lane-dense VMEM tiles.
    a = ab_ref[0]
    b = ab_ref[1]
    o_ref[...] = (a + b * x_ref[...].astype(jnp.float32)).astype(o_ref.dtype)


def _round_up(v, m):
    return ((v + m - 1) // m) * m


def _sublane_multiple(*dtypes):
    # f32 -> 8, bf16/f16 -> 16, int8/fp8 -> 32 (packed-tile second-minor rule).
    return max(8, *(32 // max(1, jnp.dtype(d).itemsize) for d in dtypes))


@jax.jit
def linear_regression_forward(a, b, x):
    """Computes a + b * x elementwise (PyTorch LinearRegression.forward).

    Output dtype follows torch type promotion: result_type(x.dtype, float32).
    """
    orig_shape = x.shape
    out_dtype = jnp.result_type(x.dtype, jnp.float32)

    ab = jnp.concatenate(
        [jnp.reshape(a, (-1,)), jnp.reshape(b, (-1,))]
    ).astype(jnp.float32)

    xf = jnp.reshape(x, (-1,))
    n = xf.shape[0]

    if n == 0:
        return jnp.zeros(orig_shape, out_dtype)

    # ---- choose a lane-dense geometry (no padding, no output slicing) ------
    lane_width = None
    for cand in (1024, 512, 256, 128):
        if n % cand == 0:
            lane_width = cand          # exact fit: whole array through the kernel
            break
    if lane_width is None:
        lane_width = 1024
        while lane_width > 128 and lane_width > n:
            lane_width //= 2

    main_n = (n // lane_width) * lane_width
    tail_n = n - main_n

    if main_n == 0:
        # Fewer than 128 elements: below one vreg, a kernel launch costs more
        # than the arithmetic, so compute directly in JAX.
        out = (ab[0] + ab[1] * xf.astype(jnp.float32)).astype(out_dtype)
        return jnp.reshape(out, orig_shape)

    rows = main_n // lane_width
    x2 = jnp.reshape(xf[:main_n], (rows, lane_width))

    in_itemsize = jnp.dtype(x.dtype).itemsize
    out_itemsize = jnp.dtype(out_dtype).itemsize
    sub = _sublane_multiple(x.dtype, out_dtype)

    # ~4 MiB (of the wider of in/out dtype) per block.
    bytes_per_row = lane_width * max(in_itemsize, out_itemsize)
    target_rows = max(sub, ((4 * 1024 * 1024) // bytes_per_row) // sub * sub)

    if rows < 2 * sub:
        block_rows = rows                      # single full-extent block
    else:
        # Guarantee >= 2 grid steps so "parallel" can shard across 2 TCs (v7x).
        half = _round_up(pl.cdiv(rows, 2), sub)
        block_rows = min(target_rows, half)

    grid = (pl.cdiv(rows, block_rows),)

    # Double-buffered in + out blocks stay well under 48 MiB (v7x physical VMEM
    # is 64 MiB; v5e/v6e scoped defaults of 16/32 MiB are raised explicitly).
    vmem_limit = 48 * 1024 * 1024

    out_main = pl.pallas_call(
        _linreg_kernel,
        out_shape=jax.ShapeDtypeStruct((rows, lane_width), out_dtype),
        grid_spec=pltpu.PrefetchScalarGridSpec(
            num_scalar_prefetch=0,
            grid=grid,
            in_specs=[
                # (a, b) packed into one tiny SMEM-resident array.
                pl.BlockSpec(memory_space=pltpu.MemorySpace.SMEM),
                # x: large lane-dense row-tiled VMEM blocks, native dtype.
                pl.BlockSpec((block_rows, lane_width), lambda i: (i, 0)),
            ],
            out_specs=pl.BlockSpec((block_rows, lane_width), lambda i: (i, 0)),
        ),
        compiler_params=pltpu.CompilerParams(
            dimension_semantics=("parallel",),
            vmem_limit_bytes=vmem_limit,
        ),
        cost_estimate=pl.CostEstimate(
            flops=2 * main_n,
            transcendentals=0,
            bytes_accessed=main_n * (in_itemsize + out_itemsize),
        ),
    )(ab, x2)

    out_flat = jnp.reshape(out_main, (-1,))
    if tail_n:
        # < lane_width leftover elements: tiny, handled in plain JAX.
        tail = (ab[0] + ab[1] * xf[main_n:].astype(jnp.float32)).astype(out_dtype)
        out_flat = jnp.concatenate([out_flat, tail])

    return jnp.reshape(out_flat, orig_shape)


if __name__ == "__main__":
    key = jax.random.PRNGKey(0)
    ka, kb, kx1, kx2 = jax.random.split(key, 4)

    # Deterministic parameter init (matches torch.randn(1) shapes).
    a = jax.random.normal(ka, (1,), dtype=jnp.float32)
    b = jax.random.normal(kb, (1,), dtype=jnp.float32)

    # (8, 130): 1040 elements, not lane-aligned -> main-slab + tail path.
    x1 = jax.random.normal(kx1, (8, 130), dtype=jnp.float32)
    out1 = jax.block_until_ready(linear_regression_forward(a, b, x1))
    ref1 = a + b * x1
    assert out1.shape == ref1.shape and out1.dtype == ref1.dtype
    assert jnp.allclose(out1, ref1, atol=1e-6, rtol=1e-6)

    # (4, 256) bf16: native-dtype streaming, torch-style promotion to float32.
    x2 = jax.random.normal(kx2, (4, 256), dtype=jnp.bfloat16)
    out2 = jax.block_until_ready(linear_regression_forward(a, b, x2))
    ref2 = a + b * x2
    assert out2.shape == ref2.shape and out2.dtype == ref2.dtype
    assert jnp.allclose(out2, ref2, atol=1e-6, rtol=1e-6)

    print("KERNEL_OK")
</pallas_src>

<mosaic_0001>
module attributes {stable_mosaic.version = 11 : i64} {
  func.func @_linreg_kernel(%arg0: i32, %arg1: memref<2xf32, #tpu.memory_space<smem>>, %arg2: memref<1x1024xf32, #tpu.memory_space<vmem>>, %arg3: memref<1x1024xf32, #tpu.memory_space<vmem>>) attributes {dimension_semantics = [#tpu.dimension_semantics<parallel>], iteration_bounds = array<i64: 1>, scalar_prefetch = 0 : i64, scratch_operands = 0 : i64, tpu.core_type = #tpu.core_type<tc>, window_params = [{transform_indices = @transform_0, window_bounds = array<i64: 2>}, {transform_indices = @transform_1, window_bounds = array<i64: 1, 1024>}, {transform_indices = @transform_2, window_bounds = array<i64: 1, 1024>}]} {
    %c0 = arith.constant 0 : index
    %0 = memref.load %arg1[%c0] : memref<2xf32, #tpu.memory_space<smem>>
    %c1 = arith.constant 1 : index
    %1 = memref.load %arg1[%c1] : memref<2xf32, #tpu.memory_space<smem>>
    %c0_0 = arith.constant 0 : index
    %c0_1 = arith.constant 0 : index
    %2 = vector.load %arg2[%c0_0, %c0_1] : memref<1x1024xf32, #tpu.memory_space<vmem>>, vector<1x1024xf32>
    %3 = vector.broadcast %1 : f32 to vector<1x1024xf32>
    %4 = arith.mulf %3, %2 : vector<1x1024xf32>
    %5 = vector.broadcast %0 : f32 to vector<1x1024xf32>
    %6 = arith.addf %5, %4 : vector<1x1024xf32>
    %c0_2 = arith.constant 0 : index
    %c0_3 = arith.constant 0 : index
    %7 = vector.load %arg3[%c0_2, %c0_3] : memref<1x1024xf32, #tpu.memory_space<vmem>>, vector<1x1024xf32>
    tpu.vector_store %arg3[%c0_2, %c0_3], %6 {strides = array<i32>} : memref<1x1024xf32, #tpu.memory_space<vmem>>, vector<1x1024xf32>,
    return
  }
  func.func @transform_0(%arg0: i32) -> i32 {
    %c0_i32 = arith.constant 0 : i32
    %c0_i32_0 = arith.constant 0 : i32
    return %c0_i32 : i32
  }
  func.func @transform_1(%arg0: i32) -> (i32, i32) {
    %c0_i32 = arith.constant 0 : i32
    %c0_i32_0 = arith.constant 0 : i32
    return %arg0, %c0_i32 : i32, i32
  }
  func.func @transform_2(%arg0: i32) -> (i32, i32) {
    %c0_i32 = arith.constant 0 : i32
    %c0_i32_0 = arith.constant 0 : i32
    return %arg0, %c0_i32 : i32, i32
  }
}

</mosaic_0001>

<bundles_post_ra>
// kernel: linear_regression_forward.1
= control target key start
LH: loop header
LB: loop body
LE: loop exit
PB: predicated region body
PF: predicated region fallthrough
CT: control target
= control target key end

     0   :  { %7 = vsyncpa [#allocation3], 0  ;;  %s78_s0 = inlined_call_operand.vmem [shape: f32[2], index: 0, kind: input, shape index: {}]   ;;  %s79_s1 = inlined_call_operand.vmem [shape: f32[1,1024], index: 1, kind: input, shape index: {}]   ;;  %s80_s2 = inlined_call_operand.vmem [shape: f32[1,1024], index: 2, kind: output, shape index: {}]  }
   0x1   :  { %s14_s11 = sshll.u32 %s78_s0, 4  ;;  %s15_s11 = int_to_ptr.vmem [resolvable:$true] %s14_s11 }
   0x2   :  { %s39_s12 = scalar_lea.vmem %s15_s11, 16  ;;  %p44_p1 = scmp.lt.s32.totalorder %s15_s11, %s15_s11 }
   0x3   :  { %p40_p0 = scmp.ne.s32.totalorder %s15_s11, %s39_s12  ;;  %p45_p2 = scmp.lt.s32.totalorder %s39_s12, %s39_s12 }
   0x5   :  { %p46_p3 = por %p45_p2, %p44_p1 }
   0x7   :  { %p47_p4 = pnand %p46_p3, %p40_p0 }
   0x9   :  { %50 = shalt.err (!%p47_p4)
}
   0xa   :  { %s53_s13 = smov [#allocation2]  }
   0xb   :  { %17 = dma.vmem_to_smem %s15_s11, 16, %s53_s13, [#allocation3]  }
   0xc   :  { %51 = dma.done.wait [#allocation3], 16  }
   0xd   :  { %52 = vsyncadd [#allocation3], 4294967280 }
   0xe   :  { %23 = sfence }
   0xf   :  { %s24_s14 = sld [smem:[#allocation2]]  ;;  %v26_v0 = vld [vmem:[%s79_s1] sm:$0xff] }
  0x10   :  { %s37_s15 = sld [smem:[#allocation2 + $0x1]] }
  0x15   :  { %v29_v2 = vstv %s24_s14 }
  0x16   :  { %v27_v1 = vstv %s37_s15 }
  0x17   :  { %v28_v3 = vmul.f32 %v27_v1, %v26_v0 }
  0x19   :  { %v30_v4 = vadd.f32 %v29_v2, %v28_v3 }
  0x1b   :  { %31 = vst [vmem:[%s80_s2] sm:$0xff] %v30_v4 }
  0x1c   :  { %36 = vsyncpa [#allocation3], 1 }

</bundles_post_ra>
